<compile_context>
chip_gen: v6e
topology: v6e:2x2x1
jax: 0.10.0
libtpu: 0.0.40
codegen_flags: <defaults>
</compile_context>

<pallas_src>
import functools

import jax
import jax.numpy as jnp
from jax.experimental import pallas as pl
from jax.experimental.pallas import tpu as pltpu


# --------------------------- Pallas kernels ---------------------------------
def _downsample_conv_kernel(x_ref, w_ref, b_ref, o_ref, xp_ref, *,
                            ho, wo, c, cout, mxu_dtype):
    """Fused pad(0,1,0,1) + 3x3/stride-2 conv for one batch element.

    x_ref : (ho, 2, wo, 2c)  folded NHWC input: x[2i+r, 2j+s, ci] -> [i, r, j, s*c+ci]
    w_ref : (9c, cout)       HWIO weights flattened (dy, dx, ci) row-major
    b_ref : (1, cout)
    o_ref : (ho, wo, cout)
    xp_ref: (ho+1, 2, wo+1, 2c) VMEM scratch = zero-padded fold (in-kernel padding)
    """
    # In-kernel zero padding (bottom row / right col of the original image).
    xp_ref[...] = jnp.zeros_like(xp_ref)
    xp_ref[0:ho, :, 0:wo, :] = x_ref[...]
    xp = xp_ref[...]

    # In-kernel im2col: 9 taps, each a static unit-stride slice of the folded,
    # padded tile; concatenated along lanes into a single (ho*wo, 9c) matrix.
    taps = []
    for dy in range(3):
        i0, r = divmod(dy, 2)            # 2*i0 + r == dy
        for dx in range(3):
            j0, s = divmod(dx, 2)        # 2*j0 + s == dx
            t = xp[i0:i0 + ho, r, j0:j0 + wo, s * c:(s + 1) * c]   # (ho, wo, c)
            taps.append(t.reshape(ho * wo, c))
    patches = jnp.concatenate(taps, axis=-1)                       # (ho*wo, 9c)

    w = w_ref[...]
    if mxu_dtype != jnp.float32:         # bf16 MXU fast path (v6e/v7x)
        patches = patches.astype(mxu_dtype)
        w = w.astype(mxu_dtype)

    acc = jnp.dot(patches, w, preferred_element_type=jnp.float32)  # (ho*wo, cout)
    acc = acc + b_ref[...]
    o_ref[...] = acc.reshape(ho, wo, cout)


def _downsample_avgpool_kernel(x_ref, o_ref, *, ho, wo, c):
    """2x2 stride-2 average pool on the folded layout (pure VPU)."""
    x = x_ref[...]                                   # (ho, 2, wo, 2c)
    s = x[:, 0, :, :] + x[:, 1, :, :]                # sum over row phase
    o_ref[...] = 0.25 * (s[:, :, 0:c] + s[:, :, c:2 * c])


# ------------------------------ wrappers -------------------------------------
def _fold(x_nchw):
    """NCHW -> folded NHWC (B*H/2, 2, W/2, 2C). The reshape after the NHWC
    transpose is free (pure bitcast of contiguous memory)."""
    bsz, c, hh, ww = x_nchw.shape
    assert hh % 2 == 0 and ww % 2 == 0, "Downsample kernel assumes even H, W"
    x = jnp.transpose(x_nchw, (0, 2, 3, 1))                  # NHWC (layout plumbing)
    return x.reshape(bsz * (hh // 2), 2, ww // 2, 2 * c)


def downsample_conv(x_nchw, w, b, *, mxu_dtype=jnp.float32):
    bsz, c, hh, ww = x_nchw.shape
    ho, wo = hh // 2, ww // 2
    cout = w.shape[0]
    xf = _fold(x_nchw)
    wmat = jnp.transpose(w, (2, 3, 1, 0)).reshape(9 * c, cout)   # (dy,dx,ci) x cout
    bias = b.reshape(1, cout)

    kernel = functools.partial(_downsample_conv_kernel, ho=ho, wo=wo, c=c,
                               cout=cout, mxu_dtype=mxu_dtype)
    out = pl.pallas_call(
        kernel,
        out_shape=jax.ShapeDtypeStruct((bsz * ho, wo, cout), jnp.float32),
        grid=(bsz,),
        in_specs=[
            pl.BlockSpec((ho, 2, wo, 2 * c), lambda bi: (bi, 0, 0, 0)),
            pl.BlockSpec((9 * c, cout), lambda bi: (0, 0)),
            pl.BlockSpec((1, cout), lambda bi: (0, 0)),
        ],
        out_specs=pl.BlockSpec((ho, wo, cout), lambda bi: (bi, 0, 0)),
        scratch_shapes=[pltpu.VMEM((ho + 1, 2, wo + 1, 2 * c), jnp.float32)],
        compiler_params=pltpu.CompilerParams(
            dimension_semantics=("parallel",),        # batches -> both TCs (v7x/megacore)
            vmem_limit_bytes=32 * 1024 * 1024,        # safe on v5e/v6e/v7x
        ),
    )(xf, wmat, bias)
    out = out.reshape(bsz, ho, wo, cout)
    return jnp.transpose(out, (0, 3, 1, 2))                     # back to NCHW


def downsample_avgpool(x_nchw):
    bsz, c, hh, ww = x_nchw.shape
    ho, wo = hh // 2, ww // 2
    xf = _fold(x_nchw)
    kernel = functools.partial(_downsample_avgpool_kernel, ho=ho, wo=wo, c=c)
    out = pl.pallas_call(
        kernel,
        out_shape=jax.ShapeDtypeStruct((bsz * ho, wo, c), jnp.float32),
        grid=(bsz,),
        in_specs=[pl.BlockSpec((ho, 2, wo, 2 * c), lambda bi: (bi, 0, 0, 0))],
        out_specs=pl.BlockSpec((ho, wo, c), lambda bi: (bi, 0, 0)),
        compiler_params=pltpu.CompilerParams(dimension_semantics=("parallel",)),
    )(xf)
    out = out.reshape(bsz, ho, wo, c)
    return jnp.transpose(out, (0, 3, 1, 2))


def downsample_forward(x_nchw, params, with_conv):
    if with_conv:
        return downsample_conv(x_nchw, params["w"], params["b"])
    return downsample_avgpool(x_nchw)


# -------------------------------- main ----------------------------------------
if __name__ == "__main__":
    B, C, H, W = 2, 32, 16, 16
    key = jax.random.PRNGKey(0)
    kx, kw, kb = jax.random.split(key, 3)
    x = jax.random.normal(kx, (B, C, H, W), jnp.float32)
    bound = 1.0 / (C * 9) ** 0.5                     # PyTorch Conv2d default init range
    w = jax.random.uniform(kw, (C, C, 3, 3), jnp.float32, minval=-bound, maxval=bound)
    b = jax.random.uniform(kb, (C,), jnp.float32, minval=-bound, maxval=bound)

    conv_fn = jax.jit(downsample_conv)
    pool_fn = jax.jit(downsample_avgpool)
    y_conv = conv_fn(x, w, b)
    y_pool = pool_fn(x)
    jax.block_until_ready((y_conv, y_pool))

    # Reference (pure XLA) for the two branches.
    ref_conv = jax.lax.conv_general_dilated(
        x, w, window_strides=(2, 2), padding=((0, 1), (0, 1)),
        dimension_numbers=("NCHW", "OIHW", "NCHW")) + b.reshape(1, C, 1, 1)
    ref_pool = x.reshape(B, C, H // 2, 2, W // 2, 2).mean(axis=(3, 5))

    assert y_conv.shape == (B, C, H // 2, W // 2)
    assert y_pool.shape == (B, C, H // 2, W // 2)
    assert jnp.allclose(y_conv, ref_conv, atol=1e-3, rtol=1e-3), \
        float(jnp.max(jnp.abs(y_conv - ref_conv)))
    assert jnp.allclose(y_pool, ref_pool, atol=1e-5, rtol=1e-5)
    print("KERNEL_OK")
</pallas_src>

<mosaic_0001>
module attributes {stable_mosaic.version = 11 : i64} {
  func.func @_downsample_conv_kernel(%arg0: i32, %arg1: memref<8x2x8x64xf32, #tpu.memory_space<vmem>>, %arg2: memref<288x32xf32, #tpu.memory_space<vmem>>, %arg3: memref<1x32xf32, #tpu.memory_space<vmem>>, %arg4: memref<8x8x32xf32, #tpu.memory_space<vmem>>, %arg5: memref<9x2x9x64xf32, #tpu.memory_space<vmem>>) attributes {dimension_semantics = [#tpu.dimension_semantics<parallel>], iteration_bounds = array<i64: 2>, scalar_prefetch = 0 : i64, scratch_operands = 1 : i64, tpu.core_type = #tpu.core_type<tc>, window_params = [{transform_indices = @transform_0, window_bounds = array<i64: 8, 2, 8, 64>}, {pipeline_mode = #tpu.pipeline_mode<synchronous>, transform_indices = @transform_1, window_bounds = array<i64: 288, 32>}, {pipeline_mode = #tpu.pipeline_mode<synchronous>, transform_indices = @transform_2, window_bounds = array<i64: 1, 32>}, {transform_indices = @transform_3, window_bounds = array<i64: 8, 8, 32>}]} {
    %cst = arith.constant 0.000000e+00 : f32
    %0 = vector.broadcast %cst : f32 to vector<9x2x9x64xf32>
    %c0 = arith.constant 0 : index
    %c0_0 = arith.constant 0 : index
    %c0_1 = arith.constant 0 : index
    %c0_2 = arith.constant 0 : index
    %1 = vector.load %arg5[%c0, %c0_0, %c0_1, %c0_2] : memref<9x2x9x64xf32, #tpu.memory_space<vmem>>, vector<9x2x9x64xf32>
    tpu.vector_store %arg5[%c0, %c0_0, %c0_1, %c0_2], %0 {strides = array<i32>} : memref<9x2x9x64xf32, #tpu.memory_space<vmem>>, vector<9x2x9x64xf32>,
    %c0_3 = arith.constant 0 : index
    %c0_4 = arith.constant 0 : index
    %c0_5 = arith.constant 0 : index
    %c0_6 = arith.constant 0 : index
    %2 = vector.load %arg1[%c0_3, %c0_4, %c0_5, %c0_6] : memref<8x2x8x64xf32, #tpu.memory_space<vmem>>, vector<8x2x8x64xf32>
    %c0_7 = arith.constant 0 : index
    %c0_8 = arith.constant 0 : index
    %c0_9 = arith.constant 0 : index
    %c0_10 = arith.constant 0 : index
    %3 = vector.load %arg5[%c0_7, %c0_8, %c0_9, %c0_10] : memref<9x2x9x64xf32, #tpu.memory_space<vmem>>, vector<8x2x8x64xf32>
    tpu.vector_store %arg5[%c0_7, %c0_8, %c0_9, %c0_10], %2 {strides = array<i32>} : memref<9x2x9x64xf32, #tpu.memory_space<vmem>>, vector<8x2x8x64xf32>,
    %c0_11 = arith.constant 0 : index
    %c0_12 = arith.constant 0 : index
    %c0_13 = arith.constant 0 : index
    %c0_14 = arith.constant 0 : index
    %4 = vector.load %arg5[%c0_11, %c0_12, %c0_13, %c0_14] : memref<9x2x9x64xf32, #tpu.memory_space<vmem>>, vector<9x2x9x64xf32>
    %5 = vector.extract_strided_slice %4 {offsets = [0, 0, 0, 0], sizes = [8, 1, 8, 32], strides = [1, 1, 1, 1]} : vector<9x2x9x64xf32> to vector<8x1x8x32xf32>
    %6 = vector.shape_cast %5 : vector<8x1x8x32xf32> to vector<8x8x32xf32>
    %7 = vector.shape_cast %6 : vector<8x8x32xf32> to vector<64x32xf32>
    %8 = vector.extract_strided_slice %4 {offsets = [0, 0, 0, 32], sizes = [8, 1, 8, 32], strides = [1, 1, 1, 1]} : vector<9x2x9x64xf32> to vector<8x1x8x32xf32>
    %9 = vector.shape_cast %8 : vector<8x1x8x32xf32> to vector<8x8x32xf32>
    %10 = vector.shape_cast %9 : vector<8x8x32xf32> to vector<64x32xf32>
    %11 = vector.extract_strided_slice %4 {offsets = [0, 0, 1, 0], sizes = [8, 1, 8, 32], strides = [1, 1, 1, 1]} : vector<9x2x9x64xf32> to vector<8x1x8x32xf32>
    %12 = vector.shape_cast %11 : vector<8x1x8x32xf32> to vector<8x8x32xf32>
    %13 = vector.shape_cast %12 : vector<8x8x32xf32> to vector<64x32xf32>
    %14 = vector.extract_strided_slice %4 {offsets = [0, 1, 0, 0], sizes = [8, 1, 8, 32], strides = [1, 1, 1, 1]} : vector<9x2x9x64xf32> to vector<8x1x8x32xf32>
    %15 = vector.shape_cast %14 : vector<8x1x8x32xf32> to vector<8x8x32xf32>
    %16 = vector.shape_cast %15 : vector<8x8x32xf32> to vector<64x32xf32>
    %17 = vector.extract_strided_slice %4 {offsets = [0, 1, 0, 32], sizes = [8, 1, 8, 32], strides = [1, 1, 1, 1]} : vector<9x2x9x64xf32> to vector<8x1x8x32xf32>
    %18 = vector.shape_cast %17 : vector<8x1x8x32xf32> to vector<8x8x32xf32>
    %19 = vector.shape_cast %18 : vector<8x8x32xf32> to vector<64x32xf32>
    %20 = vector.extract_strided_slice %4 {offsets = [0, 1, 1, 0], sizes = [8, 1, 8, 32], strides = [1, 1, 1, 1]} : vector<9x2x9x64xf32> to vector<8x1x8x32xf32>
    %21 = vector.shape_cast %20 : vector<8x1x8x32xf32> to vector<8x8x32xf32>
    %22 = vector.shape_cast %21 : vector<8x8x32xf32> to vector<64x32xf32>
    %23 = vector.extract_strided_slice %4 {offsets = [1, 0, 0, 0], sizes = [8, 1, 8, 32], strides = [1, 1, 1, 1]} : vector<9x2x9x64xf32> to vector<8x1x8x32xf32>
    %24 = vector.shape_cast %23 : vector<8x1x8x32xf32> to vector<8x8x32xf32>
    %25 = vector.shape_cast %24 : vector<8x8x32xf32> to vector<64x32xf32>
    %26 = vector.extract_strided_slice %4 {offsets = [1, 0, 0, 32], sizes = [8, 1, 8, 32], strides = [1, 1, 1, 1]} : vector<9x2x9x64xf32> to vector<8x1x8x32xf32>
    %27 = vector.shape_cast %26 : vector<8x1x8x32xf32> to vector<8x8x32xf32>
    %28 = vector.shape_cast %27 : vector<8x8x32xf32> to vector<64x32xf32>
    %29 = vector.extract_strided_slice %4 {offsets = [1, 0, 1, 0], sizes = [8, 1, 8, 32], strides = [1, 1, 1, 1]} : vector<9x2x9x64xf32> to vector<8x1x8x32xf32>
    %30 = vector.shape_cast %29 : vector<8x1x8x32xf32> to vector<8x8x32xf32>
    %31 = vector.shape_cast %30 : vector<8x8x32xf32> to vector<64x32xf32>
    %32 = tpu.concatenate %7, %10, %13, %16, %19, %22, %25, %28, %31 in 1 : vector<64x32xf32>, vector<64x32xf32>, vector<64x32xf32>, vector<64x32xf32>, vector<64x32xf32>, vector<64x32xf32>, vector<64x32xf32>, vector<64x32xf32>, vector<64x32xf32> -> vector<64x288xf32>
    %c0_15 = arith.constant 0 : index
    %c0_16 = arith.constant 0 : index
    %33 = vector.load %arg2[%c0_15, %c0_16] : memref<288x32xf32, #tpu.memory_space<vmem>>, vector<288x32xf32>
    %cst_17 = arith.constant dense<0.000000e+00> : vector<64x32xf32>
    %34 = tpu.matmul %32, %33, %cst_17 {dimension_numbers = #tpu.dot_dimension_numbers<[1], [0], [0], [1], [0, 0, 1, 1], [], []>} : vector<64x288xf32>, vector<288x32xf32>, vector<64x32xf32> -> vector<64x32xf32>
    %c0_18 = arith.constant 0 : index
    %c0_19 = arith.constant 0 : index
    %35 = vector.load %arg3[%c0_18, %c0_19] : memref<1x32xf32, #tpu.memory_space<vmem>>, vector<1x32xf32>
    %36 = vector.broadcast %35 : vector<1x32xf32> to vector<64x32xf32>
    %37 = arith.addf %34, %36 : vector<64x32xf32>
    %38 = vector.shape_cast %37 : vector<64x32xf32> to vector<8x8x32xf32>
    %c0_20 = arith.constant 0 : index
    %c0_21 = arith.constant 0 : index
    %c0_22 = arith.constant 0 : index
    %39 = vector.load %arg4[%c0_20, %c0_21, %c0_22] : memref<8x8x32xf32, #tpu.memory_space<vmem>>, vector<8x8x32xf32>
    tpu.vector_store %arg4[%c0_20, %c0_21, %c0_22], %38 {strides = array<i32>} : memref<8x8x32xf32, #tpu.memory_space<vmem>>, vector<8x8x32xf32>,
    return
  }
  func.func @transform_0(%arg0: i32) -> (i32, i32, i32, i32) {
    %c0_i32 = arith.constant 0 : i32
    %c0_i32_0 = arith.constant 0 : i32
    %c0_i32_1 = arith.constant 0 : i32
    %c0_i32_2 = arith.constant 0 : i32
    return %arg0, %c0_i32, %c0_i32_0, %c0_i32_1 : i32, i32, i32, i32
  }
  func.func @transform_1(%arg0: i32) -> (i32, i32) {
    %c0_i32 = arith.constant 0 : i32
    %c0_i32_0 = arith.constant 0 : i32
    %c0_i32_1 = arith.constant 0 : i32
    return %c0_i32, %c0_i32_0 : i32, i32
  }
  func.func @transform_2(%arg0: i32) -> (i32, i32) {
    %c0_i32 = arith.constant 0 : i32
    %c0_i32_0 = arith.constant 0 : i32
    %c0_i32_1 = arith.constant 0 : i32
    return %c0_i32, %c0_i32_0 : i32, i32
  }
  func.func @transform_3(%arg0: i32) -> (i32, i32, i32) {
    %c0_i32 = arith.constant 0 : i32
    %c0_i32_0 = arith.constant 0 : i32
    %c0_i32_1 = arith.constant 0 : i32
    return %arg0, %c0_i32, %c0_i32_0 : i32, i32, i32
  }
}

</mosaic_0001>

<bundles_post_ra>
// kernel: downsample_conv.1
= control target key start
LH: loop header
LB: loop body
LE: loop exit
PB: predicated region body
PF: predicated region fallthrough
CT: control target
= control target key end

     0   :  { %8 = vsyncpa [#allocation4], 0  ;;  %s1705_s0 = inlined_call_operand.vmem [shape: f32[16,2,8,64], index: 0, kind: input, shape index: {}]   ;;  %s1706_s1 = inlined_call_operand.vmem [shape: f32[288,32], index: 1, kind: input, shape index: {}]   ;;  %s1707_s2 = inlined_call_operand.vmem [shape: f32[1,32], index: 2, kind: input, shape index: {}]   ;;  %s1708_s3 = inlined_call_operand.hbm [shape: f32[16,8,32], index: 3, kind: output, shape index: {}]  }
   0x1   :  { %10 = vsyncpa [#allocation4 + $0x1], 0  ;;  %s1209_s12 = smov 0   ;;  %s1211_s13 = smov 0  }
   0x2   :  { %s1213_s14 = smov 0   ;;  %s1215_s15 = smov 0  }
   0x3 LB: > { %s1230_s16 = sadd.s32 4294967295, %s1180_s15   ;;  %s856_s17 = sadd.s32 4294967294, %s1180_s15   ;;  %s1180_s15 = sphi %s1215_s15, %s1715_s15   ;;  %s1176_s14 = sphi %s1213_s14, %s1714_s14   ;;  %s1172_s13 = sphi %s1211_s13, %s1713_s13   ;;  %s1168_s12 = sphi %s1209_s12, %s1712_s12  }
   0x4   : > { %s1234_s18 = sadd.s32 1, %s1180_s15   ;;  %s91_s19 = sadd.s32 1, %s1176_s14 }
   0x5   : > { %s88_s20 = ssub.s32 %s1180_s15, %s1234_s18  ;;  %p101_p0 = scmp.ne.s32.totalorder %s1176_s14, %s1172_s13 }
   0x6   : > { %p89_p1 = scmp.eq.s32.totalorder %s88_s20, 0  ;;  %p102_p2 = scmp.eq.s32.totalorder %s1230_s16, 1 }
   0x7   : > { %p107_p3 = scmp.ne.s32.totalorder %s1172_s13, %s1168_s12  ;;  %p108_p4 = scmp.eq.s32.totalorder %s856_s17, 1 }
   0x8   : > { %s1245_s21 = scalar_select %p89_p1, %s1176_s14, %s91_s19  }
   0x9   : > { %p1247_p5 = por %p102_p2, %p101_p0  ;;  %p1251_p6 = por %p108_p4, %p107_p3 }
   0xa   : > { %p859_p7 = scmp.ge.s32.totalorder %s1180_s15, 1  ;;  %p142_p8 = scmp.lt.s32.totalorder %s1180_s15, 3 }
   0xc   : > { %p143_p9 = pnand %p859_p7, %p142_p8 }
   0xd   : > { %s861_s24 = sshll.u32 (!%p143_p9), %s1230_s16, 3  ;;  %s1183_s4 = smov (!%p143_p9), 96  }
   0xe   : > { %146 = sbr.rel (%p143_p9) target bundleno = 417 (0x1a1), region = 32  ;;  %p1260_p10 = scmp.lt.s32.totalorder (!%p143_p9), %s861_s24, 15 }
   0xf   : > { %s1184_s5 = smov (!%p143_p9), 64   ;;  %s164_s9 = sand.u32 (!%p143_p9), 1, %s1172_s13  }
  0x10   : > { %s860_s10 = sshll.u32 (!%p143_p9), %s164_s9, 6  ;;  %s879_s20 = sshll.u32 (!%p143_p9), %s1230_s16, 10 }
  0x11   : > { %s1636_s19 = scalar_lea.vmem (!%p143_p9), [#allocation3], %s860_s10  ;;  %s1655_s28 = scalar_lea.hbm (!%p143_p9), %s1708_s3, %s879_s20 }
  0x12   : > { %s794_s25 = sshll.u32 (!%p143_p9), %s1636_s19, 4  ;;  %s1665_s16 = scalar_lea.sflag (!%p143_p9), [#allocation4], %s164_s9  ;;  %s1657_s25 = int_to_ptr.vmem [resolvable:$true] %s794_s25 }
  0x13   : > { %vm175_vm0 = vcmask 523264   ;;  %vm177_vm1 = vcmask 516096   ;;  %v1182_v0 = vmov 0.0   ;;  %v534_v1 = vld [vmem:[%s1706_s1 + $0xf8] sm:$0xff]  ;;  %v533_v3 = vld [vmem:[%s1706_s1 + $0xf0] sm:$0xff]  ;;  %s1717_s24 = smov (!%p1260_p10, %s861_s24), 15 }
  0x14   : > { %187 = vst.msk [vmem:[#allocation2 + $0x50] sm:$0xff] %vm175_vm0, %v1182_v0  ;;  %203 = vst.msk [vmem:[#allocation2 + $0xd0] sm:$0xff] %vm175_vm0, %v1182_v0  ;;  %v518_v2 = vld [vmem:[%s1706_s1 + $0x78] sm:$0xff]  ;;  %880 = vmatprep.subr.mxu0 %v534_v1  ;;  %968 = vmatprep.subr.mxu1 %v534_v1  ;;  %v517_v4 = vld [vmem:[%s1706_s1 + $0x70] sm:$0xff]  ;;  %s878_s11 = sshll.u32 %s1717_s24, 4  ;;  %vm295_vm2 = vcmask 1046528  }
  0x15   : > { %176 = vst.msk [vmem:[#allocation2] sm:$0xff] %vm175_vm0, %v1182_v0  ;;  %179 = vst.msk [vmem:[#allocation2 + $0x10] sm:$0xff] %vm175_vm0, %v1182_v0  ;;  %881 = vmatpush3.msra.mxu0 %v518_v2  ;;  %984 = vmatpush3.msra.mxu1 %v518_v2  ;;  %v532_v5 = vld [vmem:[%s1706_s1 + $0xe8] sm:$0xff]  ;;  %v531_v7 = vld [vmem:[%s1706_s1 + $0xe0] sm:$0xff]  ;;  %s1326_s26 = scalar_lea.vmem %s1705_s0, %s878_s11  ;;  %vm478_vm3 = vcmask 261120   ;;  %vm469_vm4 = vcmask 785408  }
  0x16   : > { %181 = vst.msk [vmem:[#allocation2 + $0x20] sm:$0xff] %vm175_vm0, %v1182_v0  ;;  %183 = vst.msk [vmem:[#allocation2 + $0x30] sm:$0xff] %vm175_vm0, %v1182_v0  ;;  %882 = vmatprep.subr.mxu0 %v533_v3  ;;  %969 = vmatprep.subr.mxu1 %v533_v3  ;;  %v516_v6 = vld [vmem:[%s1706_s1 + $0x68] sm:$0xff]  ;;  %v515_v8 = vld [vmem:[%s1706_s1 + $0x60] sm:$0xff]  ;;  %s1120_s29 = scalar_lea.vmem %s1657_s25, 1024  ;;  %s1186_s30 = smov [#allocation3]  }
  0x17   : > { %185 = vst.msk [vmem:[#allocation2 + $0x40] sm:$0xff] %vm175_vm0, %v1182_v0  ;;  %189 = vst.msk [vmem:[#allocation2 + $0x60] sm:$0xff] %vm175_vm0, %v1182_v0  ;;  %883 = vmatpush3.msra.mxu0 %v517_v4  ;;  %985 = vmatpush3.msra.mxu1 %v517_v4  ;;  %v530_v9 = vld [vmem:[%s1706_s1 + $0xd8] sm:$0xff]  ;;  %v218_v11 = vld [vmem:[%s1326_s26 + $0x28] sm:$0xff]  ;;  %p1121_p11 = scmp.ne.s32.totalorder %s1657_s25, %s1120_s29 }
  0x18   : > { %191 = vst.msk [vmem:[#allocation2 + $0x70] sm:$0xff] %vm175_vm0, %v1182_v0  ;;  %193 = vst.msk [vmem:[#allocation2 + $0x80] sm:$0xff] %vm175_vm0, %v1182_v0  ;;  %884 = vmatprep.subr.mxu0 %v532_v5  ;;  %970 = vmatprep.subr.mxu1 %v532_v5  ;;  %v514_v10 = vld [vmem:[%s1706_s1 + $0x58] sm:$0xff]  ;;  %v226_v12 = vld [vmem:[%s1326_s26 + $0x68] sm:$0xff] }
  0x19   : > { %195 = vst.msk [vmem:[#allocation2 + $0x90] sm:$0xff] %vm175_vm0, %v1182_v0  ;;  %197 = vst.msk [vmem:[#allocation2 + $0xa0] sm:$0xff] %vm175_vm0, %v1182_v0  ;;  %v214_v13 = vld [vmem:[%s1326_s26 + $0x8] sm:$0xff]  ;;  %885 = vmatpush3.msra.mxu0 %v516_v6  ;;  %986 = vmatpush3.msra.mxu1 %v516_v6  ;;  %v216_v14 = vld [vmem:[%s1326_s26 + $0x18] sm:$0xff]  ;;  %p1122_p12 = pnand %p1121_p11, %p1247_p5 }
  0x1a   : > { %199 = vst.msk [vmem:[#allocation2 + $0xb0] sm:$0xff] %vm175_vm0, %v1182_v0  ;;  %201 = vst.msk [vmem:[#allocation2 + $0xc0] sm:$0xff] %vm175_vm0, %v1182_v0  ;;  %v217_v15 = vld [vmem:[%s1326_s26 + $0x20] sm:$0xff]  ;;  %v227_v16 = vld [vmem:[%s1326_s26 + $0x70] sm:$0xff]  ;;  %886 = vmatprep.subr.mxu0 %v531_v7  ;;  %971 = vmatprep.subr.mxu1 %v531_v7 }
  0x1b   : > { %205 = vst.msk [vmem:[#allocation2 + $0xe0] sm:$0xff] %vm175_vm0, %v1182_v0  ;;  %207 = vst.msk [vmem:[#allocation2 + $0xf0] sm:$0xff] %vm175_vm0, %v1182_v0  ;;  %887 = vmatpush3.msra.mxu0 %v515_v8  ;;  %987 = vmatpush3.msra.mxu1 %v515_v8  ;;  %v529_v17 = vld [vmem:[%s1706_s1 + $0xd0] sm:$0xff]  ;;  %v528_v19 = vld [vmem:[%s1706_s1 + $0xc8] sm:$0xff]  ;;  %p1123_p13 = pneg %p1122_p12 }
  0x1c   : > { %209 = vst.msk [vmem:[#allocation2 + $0x100] sm:$0xff] %vm175_vm0, %v1182_v0  ;;  %234 = vst.msk [vmem:[#allocation2 + $0x50] sm:$0xff] %vm175_vm0, %v218_v11  ;;  %v513_v18 = vld [vmem:[%s1706_s1 + $0x50] sm:$0xff]  ;;  %v213_v21 = vld [vmem:[%s1326_s26] sm:$0xff]  ;;  %888 = vmatprep.subr.mxu0 %v530_v9  ;;  %972 = vmatprep.subr.mxu1 %v530_v9 }
  0x1d   : > { %180 = vst.msk [vmem:[#allocation2 + $0x18] sm:$0x1] %vm177_vm1, %v1182_v0  ;;  %184 = vst.msk [vmem:[#allocation2 + $0x38] sm:$0x1] %vm177_vm1, %v1182_v0  ;;  %v512_v22 = vld [vmem:[%s1706_s1 + $0x48] sm:$0xff]  ;;  %v215_v24 = vld [vmem:[%s1326_s26 + $0x10] sm:$0xff]  ;;  %889 = vmatpush3.msra.mxu0 %v514_v10  ;;  %988 = vmatpush3.msra.mxu1 %v514_v10 }
  0x1e   : > { %178 = vst.msk [vmem:[#allocation2 + $0x8] sm:$0x1] %vm177_vm1, %v1182_v0  ;;  %182 = vst.msk [vmem:[#allocation2 + $0x28] sm:$0x1] %vm177_vm1, %v1182_v0  ;;  %v225_v25 = vld [vmem:[%s1326_s26 + $0x60] sm:$0xff]  ;;  %v220_v29 = vld [vmem:[%s1326_s26 + $0x38] sm:$0xff]  ;;  %890 = vmatprep.subr.mxu0 %v529_v17  ;;  %973 = vmatprep.subr.mxu1 %v529_v17 }
  0x1f   : > { %186 = vst.msk [vmem:[#allocation2 + $0x48] sm:$0x1] %vm177_vm1, %v1182_v0  ;;  %188 = vst.msk [vmem:[#allocation2 + $0x58] sm:$0x1] %vm177_vm1, %v1182_v0  ;;  %v527_v26 = vld [vmem:[%s1706_s1 + $0xc0] sm:$0xff]  ;;  %v228_v32 = vld [vmem:[%s1326_s26 + $0x78] sm:$0xff]  ;;  %891 = vmatpush3.msra.mxu0 %v513_v18  ;;  %989 = vmatpush3.msra.mxu1 %v513_v18 }
  0x20   : > { %190 = vst.msk [vmem:[#allocation2 + $0x68] sm:$0x1] %vm177_vm1, %v1182_v0  ;;  %192 = vst.msk [vmem:[#allocation2 + $0x78] sm:$0x1] %vm177_vm1, %v1182_v0  ;;  %v511_v30 = vld [vmem:[%s1706_s1 + $0x40] sm:$0xff]  ;;  %v219_v33 = vld [vmem:[%s1326_s26 + $0x30] sm:$0xff]  ;;  %892 = vmatprep.subr.mxu0 %v528_v19  ;;  %974 = vmatprep.subr.mxu1 %v528_v19 }
  0x21   : > { %194 = vst.msk [vmem:[#allocation2 + $0x88] sm:$0x1] %vm177_vm1, %v1182_v0  ;;  %196 = vst.msk [vmem:[#allocation2 + $0x98] sm:$0x1] %vm177_vm1, %v1182_v0  ;;  %v526_v34 = vld [vmem:[%s1706_s1 + $0xb8] sm:$0xff]  ;;  %893 = vmatpush3.msra.mxu0 %v512_v22  ;;  %990 = vmatpush3.msra.mxu1 %v512_v22  ;;  %v221_v55 = vld [vmem:[%s1326_s26 + $0x40] sm:$0xff] }
  0x22   : > { %198 = vst.msk [vmem:[#allocation2 + $0xa8] sm:$0x1] %vm177_vm1, %v1182_v0  ;;  %200 = vst.msk [vmem:[#allocation2 + $0xb8] sm:$0x1] %vm177_vm1, %v1182_v0  ;;  %v510_v38 = vld [vmem:[%s1706_s1 + $0x38] sm:$0xff]  ;;  %894 = vmatprep.subr.mxu0 %v527_v26  ;;  %975 = vmatprep.subr.mxu1 %v527_v26  ;;  %v222_v56 = vld [vmem:[%s1326_s26 + $0x48] sm:$0xff] }
  0x23   : > { %202 = vst.msk [vmem:[#allocation2 + $0xc8] sm:$0x1] %vm177_vm1, %v1182_v0  ;;  %204 = vst.msk [vmem:[#allocation2 + $0xd8] sm:$0x1] %vm177_vm1, %v1182_v0  ;;  %v255_v39 = vld [vmem:[#allocation2 + $0x50] sm:$0xff]  ;;  %895 = vmatpush3.msra.mxu0 %v511_v30  ;;  %991 = vmatpush3.msra.mxu1 %v511_v30  ;;  %v224_v61 = vld [vmem:[%s1326_s26 + $0x58] sm:$0xff] }
  0x24   : > { %206 = vst.msk [vmem:[#allocation2 + $0xe8] sm:$0x1] %vm177_vm1, %v1182_v0  ;;  %208 = vst.msk [vmem:[#allocation2 + $0xf8] sm:$0x1] %vm177_vm1, %v1182_v0  ;;  %v1358_v20 = vld [vmem:[#allocation2 + $0x18] sm:$0x1]  ;;  %896 = vmatprep.subr.mxu0 %v526_v34  ;;  %976 = vmatprep.subr.mxu1 %v526_v34 }
  0x25   : > { %210 = vst.msk [vmem:[#allocation2 + $0x108] sm:$0x1] %vm177_vm1, %v1182_v0  ;;  %v1364_v23 = vld [vmem:[#allocation2 + $0x38] sm:$0x1]  ;;  %v337_v31 = vrot.slane %v1358_v20, 1  ;;  %v342_v47 = vrot.slane %v255_v39, 1  ;;  %897 = vmatpush3.msra.mxu0 %v510_v38  ;;  %992 = vmatpush3.msra.mxu1 %v510_v38 }
  0x26   : > { %242 = vst.msk [vmem:[#allocation2 + $0xd0] sm:$0xff] %vm175_vm0, %v226_v12  ;;  %230 = vst.msk [vmem:[#allocation2 + $0x10] sm:$0xff] %vm175_vm0, %v214_v13  ;;  %v256_v27 = vld [vmem:[#allocation2 + $0x58] sm:$0x1]  ;;  %v246_v35 = vld [vmem:[#allocation2 + $0x8] sm:$0x1] }
  0x27   : > { %232 = vst.msk [vmem:[#allocation2 + $0x30] sm:$0xff] %vm175_vm0, %v216_v14  ;;  %233 = vst.msk [vmem:[#allocation2 + $0x40] sm:$0xff] %vm175_vm0, %v217_v15  ;;  %v1387_v36 = vld [vmem:[#allocation2 + $0x28] sm:$0x1]  ;;  %v340_v42 = vrot.slane %v1364_v23, 1  ;;  %v343_v43 = vrot.slane %v256_v27, 1 }
  0x28   : > { %243 = vst.msk [vmem:[#allocation2 + $0xe0] sm:$0xff] %vm175_vm0, %v227_v16  ;;  %229 = vst.msk [vmem:[#allocation2] sm:$0xff] %vm175_vm0, %v213_v21  ;;  %v297_v54 = vrot.slane %v246_v35, 1  ;;  %v300_v60 = vrot.slane %v1387_v36, 1  ;;  %v260_v4 = vld [vmem:[#allocation2 + $0x78] sm:$0x1] }
  0x29   : > { %231 = vst.msk [vmem:[#allocation2 + $0x20] sm:$0xff] %vm175_vm0, %v215_v24  ;;  %241 = vst.msk [vmem:[#allocation2 + $0xc0] sm:$0xff] %vm175_vm0, %v225_v25  ;;  %v344_v63 = vsel %vm295_vm2, %v342_v47, %v343_v43  ;;  %v223_v10 = vld [vmem:[%s1326_s26 + $0x50] sm:$0xff]  ;;  %s1185_s26 = smov 32   ;;  %v346_v18 = vrot.slane %v260_v4, 1  ;;  %v524_v21 = vld [vmem:[%s1706_s1 + $0xa8] sm:$0xff] }
  0x2a   : > { %v1372_v28 = vld [vmem:[#allocation2 + $0xd8] sm:$0x1]  ;;  %236 = vst.msk [vmem:[#allocation2 + $0x70] sm:$0xff] %vm175_vm0, %v220_v29  ;;  %v1389_v37 = vld [vmem:[#allocation2 + $0xc8] sm:$0x1]  ;;  %244 = vst.msk [vmem:[#allocation2 + $0xf0] sm:$0xff] %vm175_vm0, %v228_v32 }
  0x2b   : > { %235 = vst.msk [vmem:[#allocation2 + $0x60] sm:$0xff] %vm175_vm0, %v219_v33  ;;  %v355_v44 = vrot.slane %v1372_v28, 1  ;;  %237 = vst.msk [vmem:[#allocation2 + $0x80] sm:$0xff] %vm175_vm0, %v221_v55  ;;  %v315_v3 = vrot.slane %v1389_v37, 1  ;;  %v276_v9 = vld [vmem:[#allocation2 + $0xf8] sm:$0x1] }
  0x2c   : > { %238 = vst.msk [vmem:[#allocation2 + $0x90] sm:$0xff] %vm175_vm0, %v222_v56  ;;  %240 = vst.msk [vmem:[#allocation2 + $0xb0] sm:$0xff] %vm175_vm0, %v224_v61  ;;  %v525_v15 = vld [vmem:[%s1706_s1 + $0xb0] sm:$0xff]  ;;  %v358_v19 = vrot.slane %v276_v9, 1  ;;  %v254_v20 = vld [vmem:[#allocation2 + $0x48] sm:$0x1] }
  0x2d   : > { %v271_v40 = vld [vmem:[#allocation2 + $0xd0] sm:$0xff]  ;;  %239 = vst.msk [vmem:[#allocation2 + $0xa0] sm:$0xff] %vm175_vm0, %v223_v10  ;;  %v258_v27 = vld [vmem:[#allocation2 + $0x68] sm:$0x1]  ;;  %898 = vmatprep.subr.mxu0 %v525_v15  ;;  %977 = vmatprep.subr.mxu1 %v525_v15  ;;  %v523_v30 = vld [vmem:[%s1706_s1 + $0xa0] sm:$0xff]  ;;  %v303_v32 = vrot.slane %v254_v20, 1 }
  0x2e   : > { %v247_v41 = vld [vmem:[#allocation2 + $0x10] sm:$0xff]  ;;  %v354_v45 = vrot.slane %v271_v40, 1  ;;  %v1050_v46 = vpack.i.bf16 %v255_v39, %v271_v40  ;;  %v1398_v50 = vld [vmem:[#allocation2 + $0x40] sm:$0xff]  ;;  %v508_v28 = vld [vmem:[%s1706_s1 + $0x28] sm:$0xff]  ;;  %v306_v38 = vrot.slane %v258_v27, 1 }
  0x2f   : > { %v251_v48 = vld [vmem:[#allocation2 + $0x30] sm:$0xff]  ;;  %v336_v49 = vrot.slane %v247_v41, 1  ;;  %v1400_v51 = vld [vmem:[#allocation2 + $0xe0] sm:$0xff]  ;;  %v274_v29 = vld [vmem:[#allocation2 + $0xe8] sm:$0x1]  ;;  %v302_v40 = vrot.slane %v1398_v50, 1 }
  0x30   : > { %v339_v52 = vrot.slane %v251_v48, 1  ;;  %v1045_v53 = vpack.i.bf16 %v251_v48, %v247_v41  ;;  %1051 = vrot.lane.b32.xlu1 %v1050_v46, %s1183_s4  ;;  %v1055_v57 = vpack.i.bf16 %v1400_v51, %v1398_v50  ;;  %v1408_v59 = vld [vmem:[#allocation2] sm:$0xff]  ;;  %v356_v6 = vsel %vm295_vm2, %v354_v45, %v355_v44  ;;  %v509_v16 = vld [vmem:[%s1706_s1 + $0x30] sm:$0xff]  ;;  %v522_v39 = vld [vmem:[%s1706_s1 + $0x98] sm:$0xff] }
  0x31   : > { %v338_v58 = vsel %vm295_vm2, %v336_v49, %v337_v31  ;;  %v1417_v0 = vld [vmem:[#allocation2 + $0x20] sm:$0xff]  ;;  %v296_v1 = vrot.slane %v1408_v59, 1  ;;  %v259_v12 = vld [vmem:[#allocation2 + $0x70] sm:$0xff]  ;;  %v1080_v17 = vpack.i.bf16 %v344_v63, %v356_v6  ;;  %899 = vmatpush3.msra.mxu0 %v509_v16  ;;  %993 = vmatpush3.msra.mxu1 %v509_v16  ;;  %v317_v34 = vrot.slane %v1400_v51, 1  ;;  %v506_v44 = vld [vmem:[%s1706_s1 + $0x18] sm:$0xff] }
  0x32   : > { %1046 = vrot.lane.b32.xlu0 %v1045_v53, %s1183_s4  ;;  %v341_v62 = vsel %vm295_vm2, %v339_v52, %v340_v42  ;;  %v1420_v2 = vld [vmem:[#allocation2 + $0xc0] sm:$0xff]  ;;  %v299_v7 = vrot.slane %v1417_v0, 1  ;;  %v275_v13 = vld [vmem:[#allocation2 + $0xf0] sm:$0xff]  ;;  %v345_v25 = vrot.slane %v259_v12, 1  ;;  %900 = vmatprep.subr.mxu0 %v524_v21  ;;  %v318_v43 = vrot.slane %v274_v29, 1  ;;  %v504_v61 = vld [vmem:[%s1706_s1 + $0x8] sm:$0xff] }
  0x33   : > { %v1060_v5 = vpack.i.bf16 %v341_v62, %v338_v58  ;;  %v314_v8 = vrot.slane %v1420_v2, 1  ;;  %v298_v11 = vsel %vm295_vm2, %v296_v1, %v297_v54  ;;  %v357_v24 = vrot.slane %v275_v13, 1  ;;  %v1448_v26 = vld [vmem:[#allocation2 + $0x60] sm:$0xff]  ;;  %901 = vmatpush3.msra.mxu0 %v508_v28  ;;  %978 = vmatprep.subr.mxu1 %v524_v21  ;;  %v521_v46 = vld [vmem:[%s1706_s1 + $0x90] sm:$0xff]  ;;  %v264_v56 = vld [vmem:[#allocation2 + $0x98] sm:$0x1] }
  0x34   : > { %1056 = vrot.lane.b32.xlu1 %v1055_v57, %s1184_s5  ;;  %v1065_v14 = vpack.i.bf16 %v298_v11, %v1417_v0  ;;  %v1443_v22 = vsel %vm295_vm2, %v299_v7, %v300_v60  ;;  %v1070_v31 = vpack.i.bf16 %v259_v12, %v275_v13  ;;  %v507_v33 = vld [vmem:[%s1706_s1 + $0x20] sm:$0xff]  ;;  %v305_v37 = vrot.slane %v1448_v26, 1  ;;  %902 = vmatprep.subr.mxu0 %v523_v30  ;;  %v505_v52 = vld [vmem:[%s1706_s1 + $0x10] sm:$0xff]  ;;  %v262_v57 = vld [vmem:[#allocation2 + $0x88] sm:$0x1] }
  0x35   : > { %v1446_v23 = vsel %vm295_vm2, %v314_v8, %v315_v3  ;;  %v1464_v36 = vld [vmem:[#allocation2 + $0x100] sm:$0xff]  ;;  %v347_v41 = vsel %vm295_vm2, %v345_v25, %v346_v18  ;;  %v359_v42 = vsel %vm295_vm2, %v357_v24, %v358_v19  ;;  %903 = vmatpush3.msra.mxu0 %v507_v33  ;;  %994 = vmatpush3.msra.mxu1 %v508_v28  ;;  %v263_v55 = vld [vmem:[#allocation2 + $0x90] sm:$0xff]  ;;  %v520_v58 = vld [vmem:[%s1706_s1 + $0x88] sm:$0xff]  ;;  %v349_v1 = vrot.slane %v264_v56, 1 }
  0x36   : > { %1061 = vrot.lane.b32.xlu0 %v1060_v5, %s1185_s26  ;;  %v1085_v35 = vpack.i.bf16 %v1446_v23, %v1443_v22  ;;  %v1075_v45 = vpack.i.bf16 %v1464_v36, %v1448_v26  ;;  %904 = vmatprep.subr.mxu0 %v522_v39  ;;  %v1090_v47 = vpack.i.bf16 %v347_v41, %v359_v42  ;;  %v1483_v48 = vld [vmem:[#allocation2 + $0x80] sm:$0xff]  ;;  %v348_v63 = vrot.slane %v263_v55, 1  ;;  %v267_v5 = vld [vmem:[#allocation2 + $0xb0] sm:$0xff]  ;;  %v268_v7 = vld [vmem:[#allocation2 + $0xb8] sm:$0x1] }
  0x37   : > { %v1486_v49 = vsel %vm295_vm2, %v305_v37, %v306_v38  ;;  %979 = vmatprep.subr.mxu1 %v523_v30  ;;  %v1492_v53 = vsel %vm295_vm2, %v302_v40, %v303_v32  ;;  %v1495_v54 = vsel %vm295_vm2, %v317_v34, %v318_v43  ;;  %905 = vmatpush3.msra.mxu0 %v506_v44  ;;  %v519_v3 = vld [vmem:[%s1706_s1 + $0x80] sm:$0xff]  ;;  %v308_v4 = vrot.slane %v1483_v48, 1  ;;  %v266_v9 = vld [vmem:[#allocation2 + $0xa8] sm:$0x1]  ;;  %v1528_v18 = vld [vmem:[%s1706_s1 + $0x118] sm:$0xff] }
  0x38   : > { %1066 = vrot.lane.b32.xlu1 %v1065_v14, %s1184_s5  ;;  %995 = vmatpush3.msra.mxu1 %v507_v33  ;;  %v1100_v60 = vpack.i.bf16 %v1486_v49, %v1483_v48  ;;  %v1095_v62 = vpack.i.bf16 %v1495_v54, %v1492_v53  ;;  %v309_v6 = vrot.slane %v262_v57, 1  ;;  %v1513_v8 = vld [vmem:[#allocation2 + $0xa0] sm:$0xff]  ;;  %v351_v11 = vrot.slane %v267_v5, 1  ;;  %v278_v20 = vld [vmem:[#allocation2 + $0x108] sm:$0x1] }
  0x39   : > { %906 = vmatprep.subr.mxu0 %v521_v46  ;;  %980 = vmatprep.subr.mxu1 %v522_v39  ;;  %v503_v10 = vld [vmem:[%s1706_s1] sm:$0xff]  ;;  %v1105_v12 = vpack.i.bf16 %v267_v5, %v263_v55  ;;  %v350_v13 = vsel %vm295_vm2, %v348_v63, %v349_v1  ;;  %v352_v14 = vrot.slane %v268_v7, 1  ;;  %v311_v16 = vrot.slane %v1513_v8, 1 }
  0x3a   : > { %1081 = vrot.lane.b32.xlu0 %v1080_v17, %s1185_s26  ;;  %907 = vmatpush3.msra.mxu0 %v505_v52  ;;  %v1522_v15 = vsel %vm295_vm2, %v308_v4, %v309_v6  ;;  %v312_v17 = vrot.slane %v266_v9, 1  ;;  %v362_v19 = vrot.slane %v1464_v36, 1  ;;  %v363_v25 = vrot.slane %v278_v20, 1  ;;  %v537_v20 = vld [vmem:[%s1706_s1 + $0x110] sm:$0xff] }
  0x3b   : > { %996 = vmatpush3.msra.mxu1 %v506_v44  ;;  %908 = vmatprep.subr.mxu0 %v520_v58  ;;  %v1110_v21 = vpack.i.bf16 %v1522_v15, %v1513_v8  ;;  %v353_v24 = vsel %vm295_vm2, %v351_v11, %v352_v14 }
  0x3c   : > { %1071 = vrot.lane.b32.xlu1 %v1070_v31, %s1183_s4  ;;  %981 = vmatprep.subr.mxu1 %v521_v46  ;;  %v1538_v27 = vsel %vm295_vm2, %v311_v16, %v312_v17  ;;  %v1541_v28 = vsel %vm295_vm2, %v362_v19, %v363_v25 }
  0x3d   : > { %909 = vmatpush3.msra.mxu0 %v504_v61  ;;  %997 = vmatpush3.msra.mxu1 %v505_v52  ;;  %v1115_v29 = vpack.i.bf16 %v1538_v27, %v1420_v2 }
  0x3e   : > { %1086 = vrot.lane.b32.xlu0 %v1085_v35, %s1184_s5  ;;  %910 = vmatprep.subr.mxu0 %v519_v3 }
  0x3f   : > { %982 = vmatprep.subr.mxu1 %v520_v58  ;;  %911 = vmatpush3.msra.mxu0 %v503_v10 }
  0x40   : > { %1076 = vrot.lane.b32.xlu1 %v1075_v45, %s1184_s5  ;;  %998 = vmatpush3.msra.mxu1 %v504_v61 }
  0x41   : > { %983 = vmatprep.subr.mxu1 %v519_v3 }
  0x42   : > { %1091 = vrot.lane.b32.xlu0 %v1090_v47, %s1185_s26  ;;  %999 = vmatpush3.msra.mxu1 %v503_v10 }
  0x43   : > { %948 = vmatprep.subr.mxu1 %v1528_v18 }
  0x44   : > { %1101 = vrot.lane.b32.xlu1 %v1100_v60, %s1184_s5 }
  0x46   : > { %1096 = vrot.lane.b32.xlu0 %v1095_v62, %s1184_s5 }
  0x48   : > { %421 = vrot.lane.b32.xlu1 %v350_v13, %s1185_s26 }
  0x4a   : > { %1106 = vrot.lane.b32.xlu0 %v1105_v12, %s1183_s4  ;;  %s1124_s4 = sshll.u32 %s1186_s30, 4  ;;  %s1125_s4 = int_to_ptr.vmem [resolvable:$false] %s1124_s4 }
  0x4b   : > { %p1127_p0 = scmp.lt.s32.totalorder %s1657_s25, %s1125_s4 }
  0x4c   : > { %423 = vrot.lane.b32.xlu1 %v353_v24, %s1185_s26 }
  0x4e   : > { %1111 = vrot.lane.b32.xlu0 %v1110_v21, %s1184_s5 }
  0x52   : > { %1116 = vrot.lane.b32.xlu0 %v1115_v29, %s1184_s5  ;;  %s1126_s5 = scalar_lea.vmem %s1125_s4, 2048 }
  0x53   : > { %p1128_p1 = scmp.lt.s32.totalorder %s1126_s5, %s1120_s29 }
  0x55   : > { %p1129_p2 = por %p1128_p1, %p1127_p0 }
  0x57   : > { %p1130_p3 = pnand %p1129_p2, %p1123_p13 }
  0xa2   : > { %v1548_v30 = vpop.permute.xlu1 %1051 }
  0xa3   : > { %v1053_v45 = vunpack.i.l.bf16 %v1548_v30  ;;  %v1054_v6 = vunpack.i.h.bf16 %v1548_v30 }
  0xa4   : > { %v1047_v31 = vpop.permute.xlu0 %1046 }
  0xa5   : > { %v1049_v34 = vunpack.i.h.bf16 %v1047_v31  ;;  %v1048_v38 = vunpack.i.l.bf16 %v1047_v31 }
  0xa6   : > { %v1057_v32 = vpop.permute.xlu1 %1056 }
  0xa7   : > { %v1058_v37 = vunpack.i.l.bf16 %v1057_v32  ;;  %v1059_v41 = vunpack.i.h.bf16 %v1057_v32 }
  0xa8   : > { %v1062_v33 = vpop.permute.xlu0 %1061 }
  0xa9   : > { %v1064_v35 = vunpack.i.h.bf16 %v1062_v33  ;;  %v1063_v36 = vunpack.i.l.bf16 %v1062_v33 }
  0xaa   : > { %v1067_v39 = vpop.permute.xlu1 %1066 }
  0xab   : > { %v480_v40 = vsel %vm478_vm3, %v1049_v34, %v1064_v35  ;;  %v1069_v43 = vunpack.i.h.bf16 %v1067_v39  ;;  %v1068_v44 = vunpack.i.l.bf16 %v1067_v39  ;;  %v479_v47 = vsel %vm478_vm3, %v1048_v38, %v1063_v36 }
  0xac   : > { %v1082_v42 = vpop.permute.xlu0 %1081  ;;  %v488_v56 = vsel %vm175_vm0, %v480_v40, %v1058_v37 }
  0xad   : > { %v1083_v46 = vunpack.i.l.bf16 %v1082_v42  ;;  %v487_v52 = vsel %vm175_vm0, %v479_v47, %v1068_v44  ;;  %v461_v55 = vsel %vm175_vm0, %v1408_v59, %v1069_v43  ;;  %v1084_v62 = vunpack.i.h.bf16 %v1082_v42 }
  0xae   : > { %v1557_v57 = vpop.permute.xlu1 %1071  ;;  %v495_v58 = vsel %vm469_vm4, %v487_v52, %v1068_v44  ;;  %v470_v60 = vsel %vm469_vm4, %v461_v55, %v1048_v38  ;;  %v496_v5 = vsel %vm469_vm4, %v488_v56, %v1058_v37 }
  0xaf   : > { %v485_v61 = vsel %vm478_vm3, %v1053_v45, %v1083_v46  ;;  %626 = vmatprep.mubr.f32.mxu0 %v495_v58  ;;  %v1074_v7 = vunpack.i.h.bf16 %v1557_v57  ;;  %v1073_v9 = vunpack.i.l.bf16 %v1557_v57 }
  0xb0   : > { %v1087_v63 = vpop.permute.xlu0 %1086  ;;  %v493_v1 = vsel %vm175_vm0, %v485_v61, %v1059_v41  ;;  %627 = vmatmul.mubr.f32.vlgmr.msra.gmra.mxu0 %v470_v60 }
  0xb1   : > { %v1089_v3 = vunpack.i.h.bf16 %v1087_v63  ;;  %v1088_v4 = vunpack.i.l.bf16 %v1087_v63  ;;  %v501_v59 = vsel %vm469_vm4, %v493_v1, %v1059_v41  ;;  %631 = vmatprep.mubr.f32.mxu0 %v496_v5 }
  0xb2   : > { %656 = vmatprep.mubr.f32.mxu1 %v501_v59  ;;  %v1077_v10 = vpop.permute.xlu1 %1076 }
  0xb3   : > { %v467_v11 = vsel %vm175_vm0, %v1420_v2, %v1089_v3  ;;  %v462_v12 = vsel %vm175_vm0, %v1417_v0, %v1088_v4  ;;  %v1079_v14 = vunpack.i.h.bf16 %v1077_v10  ;;  %v1078_v16 = vunpack.i.l.bf16 %v1077_v10  ;;  %v536_v0 = vld [vmem:[%s1706_s1 + $0x108] sm:$0xff] }
  0xb4   : > { %v1092_v13 = vpop.permute.xlu0 %1091  ;;  %v476_v17 = vsel %vm469_vm4, %v467_v11, %v1053_v45  ;;  %v471_v19 = vsel %vm469_vm4, %v462_v12, %v1049_v34  ;;  %v481_v2 = vsel %vm478_vm3, %v1054_v6, %v1084_v62 }
  0xb5   : > { %v1094_v21 = vunpack.i.h.bf16 %v1092_v13  ;;  %v1093_v24 = vunpack.i.l.bf16 %v1092_v13  ;;  %657 = vmatmul.mubr.f32.vlgmr.msra.gmra.mxu1 %v476_v17  ;;  %632 = vmatmul.mubr.f32.gmra.mxu0 %v471_v19  ;;  %v489_v25 = vsel %vm175_vm0, %v481_v2, %v1078_v16 }
  0xb6   : > { %949 = vmatpush3.msra.mxu1 %v1528_v18  ;;  %v1102_v29 = vpop.permute.xlu1 %1101  ;;  %v497_v30 = vsel %vm469_vm4, %v489_v25, %v1078_v16  ;;  %v535_v18 = vld [vmem:[%s1706_s1 + $0x100] sm:$0xff] }
  0xb7   : > { %v486_v31 = vsel %vm478_vm3, %v1073_v9, %v1093_v24  ;;  %950 = vmatprep.subr.mxu1 %v537_v20  ;;  %v1103_v33 = vunpack.i.l.bf16 %v1102_v29  ;;  %636 = vmatprep.mubr.f32.mxu0 %v497_v30  ;;  %v482_v35 = vsel %vm478_vm3, %v1074_v7, %v1094_v21  ;;  %v1104_v38 = vunpack.i.h.bf16 %v1102_v29 }
  0xb8   : > { %v1097_v32 = vpop.permute.xlu0 %1096  ;;  %v494_v34 = vsel %vm175_vm0, %v486_v31, %v1079_v14  ;;  %951 = vmatpush3.msra.mxu1 %v537_v20 }
  0xb9   : > { %v1099_v36 = vunpack.i.h.bf16 %v1097_v32  ;;  %v1098_v37 = vunpack.i.l.bf16 %v1097_v32  ;;  %v502_v39 = vsel %vm469_vm4, %v494_v34, %v1079_v14  ;;  %952 = vmatprep.subr.mxu1 %v536_v0  ;;  %v490_v40 = vsel %vm175_vm0, %v482_v35, %v1103_v33 }
  0xba   : > { %661 = vmatprep.mubr.f32.mxu1 %v502_v39  ;;  %953 = vmatpush3.msra.mxu1 %v536_v0  ;;  %v498_v43 = vsel %vm469_vm4, %v490_v40, %v1103_v33  ;;  %v422_v47 = vpop.permute.xlu1 %421  ;;  %v464_v52 = vsel %vm175_vm0, %v1448_v26, %v1104_v38 }
  0xbb   : > { %v463_v41 = vsel %vm175_vm0, %v1398_v50, %v1098_v37  ;;  %v468_v42 = vsel %vm175_vm0, %v1400_v51, %v1099_v36  ;;  %954 = vmatprep.subr.mxu1 %v535_v18  ;;  %v473_v51 = vsel %vm469_vm4, %v464_v52, %v1074_v7 }
  0xbc   : > { %v1107_v44 = vpop.permute.xlu0 %1106  ;;  %v472_v45 = vsel %vm469_vm4, %v463_v41, %v1054_v6  ;;  %v477_v46 = vsel %vm469_vm4, %v468_v42, %v1073_v9  ;;  %955 = vmatpush3.msra.mxu1 %v535_v18 }
  0xbd   : > { %637 = vmatmul.mubr.f32.gmra.mxu0 %v472_v45  ;;  %662 = vmatmul.mubr.f32.gmra.mxu1 %v477_v46  ;;  %v1108_v55 = vunpack.i.l.bf16 %v1107_v44  ;;  %v1109_v61 = vunpack.i.h.bf16 %v1107_v44 }
  0xbe   : > { %641 = vmatprep.mubr.f32.mxu0 %v498_v43  ;;  %956 = vmatprep.mubr.msk.f32.mxu1 %vm478_vm3, %v1443_v22  ;;  %v424_v26 = vpop.permute.xlu1 %423 }
  0xbf   : > { %v483_v58 = vsel %vm478_vm3, %v1108_v55, %v422_v47 }
  0xc0   : > { %v1112_v50 = vpop.permute.xlu0 %1111 }
  0xc1   : > { %v1114_v56 = vunpack.i.h.bf16 %v1112_v50  ;;  %v1113_v57 = vunpack.i.l.bf16 %v1112_v50  ;;  %642 = vmatmul.mubr.f32.gmra.mxu0 %v473_v51  ;;  %957 = vmatmul.mubr.msk.f32.vlgmr.msra.gmra.mxu1 %vm478_vm3, %v1492_v53 }
  0xc2   : > { %959 = vmatprep.mubr.msk.f32.mxu1 %vm478_vm3, %v1486_v49  ;;  %v484_v49 = vsel %vm478_vm3, %v1109_v61, %v424_v26 }
  0xc3   : > { %v491_v60 = vsel %vm175_vm0, %v483_v58, %v1113_v57  ;;  %v465_v22 = vsel %vm175_vm0, %v1483_v48, %v1114_v56 }
  0xc4   : > { %v1117_v62 = vpop.permute.xlu0 %1116  ;;  %v499_v63 = vsel %vm469_vm4, %v491_v60, %v1113_v57  ;;  %v474_v1 = vsel %vm469_vm4, %v465_v22, %v1108_v55 }
  0xc5   : > { %v1119_v3 = vunpack.i.h.bf16 %v1117_v62  ;;  %v1118_v4 = vunpack.i.l.bf16 %v1117_v62  ;;  %646 = vmatprep.mubr.f32.mxu0 %v499_v63  ;;  %960 = vmatmul.mubr.msk.f32.gmra.mxu1 %vm478_vm3, %v1522_v15 }
  0xc6   : > { %647 = vmatmul.mubr.f32.gmra.mxu0 %v474_v1  ;;  %962 = vmatprep.mubr.msk.f32.mxu1 %vm478_vm3, %v1538_v27 }
  0xc7   : > { %v492_v48 = vsel %vm175_vm0, %v484_v49, %v1118_v4  ;;  %v466_v53 = vsel %vm175_vm0, %v1513_v8, %v1119_v3 }
  0xc8   : > { %v500_v59 = vsel %vm469_vm4, %v492_v48, %v1118_v4  ;;  %v475_v5 = vsel %vm469_vm4, %v466_v53, %v1109_v61 }
  0xc9   : > { %651 = vmatprep.mubr.f32.mxu0 %v500_v59  ;;  %963 = vmatmul.mubr.msk.f32.gmra.mxu1 %vm478_vm3, %v1446_v23 }
  0xca   : > { %652 = vmatmul.mubr.f32.gmra.mxu0 %v475_v5  ;;  %965 = vmatprep.mubr.msk.f32.mxu1 %vm478_vm3, %v1495_v54  ;;  %v864_v54 = vld [vmem:[%s1707_s2] ss:$0 sm:$0xff] }
  0xcd   : > { %966 = vmatmul.mubr.msk.f32.gmra.mxu1 %vm478_vm3, %v1541_v28 }
 0x170   : > { %v912_v15 = vpop.f32.mrf.mxu0 }
 0x172   : > { %v913_v27 = vpop.f32.mrf.mxu0 }
 0x173   : > { %v914_v13 = vadd.f32 %v913_v27, %v912_v15 }
 0x175   : > { %v915_v6 = vpop.f32.mrf.mxu0  ;;  %v930_v8 = vpop.f32.mrf.mxu1  ;;  %v629_v21 = vadd.f32 %v914_v13, %v864_v54 }
 0x177   : > { %v916_v7 = vpop.f32.mrf.mxu0  ;;  %v931_v9 = vpop.f32.mrf.mxu1 }
 0x178   : > { %v917_v10 = vadd.f32 %v916_v7, %v915_v6  ;;  %v932_v39 = vadd.f32 %v931_v9, %v930_v8 }
 0x17a   : > { %v634_v28 = vadd.f32 %v917_v10, %v864_v54  ;;  %v659_v55 = vadd.f32 %v932_v39, %v864_v54 }
 0x17d   : > { %v918_v11 = vpop.f32.mrf.mxu0  ;;  %v933_v12 = vpop.f32.mrf.mxu1 }
 0x17f   : > { %v919_v23 = vpop.f32.mrf.mxu0  ;;  %v934_v14 = vpop.f32.mrf.mxu1 }
 0x180   : > { %v920_v19 = vadd.f32 %v919_v23, %v918_v11  ;;  %v935_v34 = vadd.f32 %v934_v14, %v933_v12 }
 0x181   : > { %v921_v16 = vpop.f32.mrf.mxu0  ;;  %v958_v17 = vpop.f32.mrf.mxu1 }
 0x182   : > { %v739_v20 = vadd.f32 %v958_v17, %v634_v28  ;;  %v639_v32 = vadd.f32 %v920_v19, %v864_v54  ;;  %v664_v44 = vadd.f32 %v935_v34, %v864_v54 }
 0x183   : > { %v922_v24 = vpop.f32.mrf.mxu0  ;;  %v733_v2 = vpop.f32.mrf.mxu1 }
 0x184   : > { %773 = vst.msk [vmem:[%s1636_s19 + $0x8] sm:$0xff] %vm478_vm3, %v739_v20  ;;  %v923_v25 = vadd.f32 %v922_v24, %v921_v16  ;;  %v734_v0 = vadd.f32 %v733_v2, %v629_v21 }
 0x185   : > { %v961_v29 = vpop.f32.mrf.mxu1 }
 0x186   : > { %772 = vst.msk [vmem:[%s1636_s19] sm:$0xff] %vm478_vm3, %v734_v0  ;;  %v644_v30 = vadd.f32 %v923_v25, %v864_v54  ;;  %v924_v31 = vpop.f32.mrf.mxu0 }
 0x187   : > { %v743_v33 = vpop.f32.mrf.mxu1 }
 0x188   : > { %v749_v35 = vadd.f32 %v961_v29, %v644_v30  ;;  %v744_v18 = vadd.f32 %v743_v33, %v639_v32  ;;  %v925_v36 = vpop.f32.mrf.mxu0 }
 0x189   : > { %v926_v37 = vadd.f32 %v925_v36, %v924_v31  ;;  %v964_v38 = vpop.f32.mrf.mxu1 }
 0x18a   : > { %775 = vst.msk [vmem:[%s1636_s19 + $0x18] sm:$0xff] %vm478_vm3, %v749_v35  ;;  %774 = vst.msk [vmem:[%s1636_s19 + $0x10] sm:$0xff] %vm478_vm3, %v744_v18  ;;  %v927_v40 = vpop.f32.mrf.mxu0 }
 0x18b   : > { %v649_v41 = vadd.f32 %v926_v37, %v864_v54  ;;  %v753_v42 = vpop.f32.mrf.mxu1 }
 0x18c   : > { %v928_v43 = vpop.f32.mrf.mxu0 }
 0x18d   : > { %v754_v45 = vadd.f32 %v753_v42, %v649_v41  ;;  %v929_v46 = vadd.f32 %v928_v43, %v927_v40  ;;  %v967_v47 = vpop.f32.mrf.mxu1 }
 0x18e   : > { %v769_v52 = vadd.f32 %v967_v47, %v664_v44 }
 0x18f   : > { %776 = vst.msk [vmem:[%s1636_s19 + $0x20] sm:$0xff] %vm478_vm3, %v754_v45  ;;  %v654_v50 = vadd.f32 %v929_v46, %v864_v54  ;;  %v763_v51 = vpop.f32.mrf.mxu1 }
 0x190   : > { %779 = vst.msk [vmem:[%s1636_s19 + $0x38] sm:$0xff] %vm478_vm3, %v769_v52  ;;  %v764_v56 = vadd.f32 %v763_v51, %v659_v55 }
 0x191   : > { %v759_v57 = vadd.f32 %v964_v38, %v654_v50 }
 0x192   : > { %778 = vst.msk [vmem:[%s1636_s19 + $0x30] sm:$0xff] %vm478_vm3, %v764_v56 }
 0x193   : > { %777 = vst.msk [vmem:[%s1636_s19 + $0x28] sm:$0xff] %vm478_vm3, %v759_v57 }
 0x194   : > { %1133 = shalt.err (!%p1130_p3)
}
 0x195   : > { %s1134_s26 = scalar_lea.hbm %s1655_s28, 1024  ;;  %s1138_s8 = scalar_lea.hbm %s1708_s3, 2048 }
 0x196   : > { %p1135_p4 = scmp.ne.s32.totalorder %s1655_s28, %s1134_s26  ;;  %p1139_p9 = scmp.lt.s32.totalorder %s1655_s28, %s1708_s3 }
 0x197   : > { %p1140_p10 = scmp.lt.s32.totalorder %s1138_s8, %s1134_s26 }
 0x198   : > { %p1136_p7 = pnand %p1135_p4, %p1247_p5 }
 0x199   : > { %p1141_p11 = por %p1140_p10, %p1139_p9 }
 0x19a   : > { %p1137_p8 = pneg %p1136_p7 }
 0x19c   : > { %p1142_p12 = pnand %p1141_p11, %p1137_p8 }
 0x19e   : > { %1145 = shalt.err (!%p1142_p12)
}
 0x19f   : > { %s1187_s11 = smov 128   ;;  %s1188_s17 = smov 8  }
 0x1a0   : > { %1000 = dma.vmem_to_hbm [thread:$0]  (%p1247_p5), %s1657_s25, 1024, %s1655_s28, %s1665_s16, %s1187_s11, %s1187_s11, %s1188_s17  }
 0x1a1 PF: > { %p1006_p13 = scmp.ge.s32.totalorder %s1180_s15, 2  ;;  %s809_s19 = sand.u32 1, %s1168_s12  }
 0x1a2   : > { %s810_s20 = scalar_lea.sflag [#allocation4], %s809_s19 }
 0x1a3   : > { %p1003_p0 = pnand %p1006_p13, %p1251_p6 }
 0x1a5   : > { %p1004_p1 = pneg %p1003_p0 }
 0x1a7   : > { %1163 = dma.done.wait (%p1004_p1), %s810_s20, 1024  }
 0x1a8   : > { %1165 = vsyncadd (%p1004_p1), %s810_s20, 4294966272  ;;  %p13_p2 = scmp.ge.s32.totalorder %s1234_s18, 4   ;;  %s1712_s12 = smov %s1172_s13 }
 0x1a9   : > { %s1713_s13 = smov %s1176_s14  ;;  %s1714_s14 = smov %s1245_s21 }
 0x1aa   : > { %s1715_s15 = smov %s1234_s18  ;;  %15 = sbr.rel (!%p13_p2) target bundleno = 3 (0x3), region = 67 }
 0x1af   :  { %815 = vsyncpa [#allocation4], 1 }
 0x1b0   :  { %817 = vsyncpa [#allocation4 + $0x1], 1 }

</bundles_post_ra>
